<compile_context>
chip_gen: v7x
topology: tpu7x:2x2x1
jax: 0.10.0
libtpu: 0.0.40
codegen_flags: <defaults>
</compile_context>

<pallas_src>
import functools

import jax
import jax.numpy as jnp
from jax.experimental import pallas as pl
from jax.experimental.pallas import tpu as pltpu

# Default norse LIFRefracParameters
TAU_SYN_INV = 1.0 / 5e-3   # 200.0
TAU_MEM_INV = 1.0 / 1e-2   # 100.0
V_LEAK = 0.0
V_TH = 1.0
V_RESET = 0.0
RHO_RESET = 5.0
DT = 0.001

LANE = 128
SUBLANE = 8
VMEM_LIMIT = 48 * 1024 * 1024   # leaves headroom on v7x (64 MiB physical)


def _round_up(a, b):
    return ((a + b - 1) // b) * b


# ----------------------------------------------------------------------------
# Shared per-step math (bit-exact vs. the float-mask reference: 0/1 masks,
# v_reset = 0, strict '> 0' heaviside).
# ----------------------------------------------------------------------------
def _lif_refrac_math(x, v, cur, rho, dt):
    dv = jnp.float32(dt * TAU_MEM_INV) * ((V_LEAK - v) + cur)
    v_decayed = v + dv
    i_decayed = cur + jnp.float32(-dt * TAU_SYN_INV) * cur

    z = (v_decayed - V_TH) > 0.0                       # heaviside, strict >
    v_after = jnp.where(z, jnp.float32(V_RESET), v_decayed)
    i_new = i_decayed + x

    refrac = rho > 0.0                                 # heaviside(rho)
    v_new = jnp.where(refrac, v, v_after)              # hold OLD v while refractory
    z_new = jnp.logical_and(z, jnp.logical_not(refrac))
    rho_dec = jnp.maximum(jnp.where(refrac, rho - 1.0, rho), 0.0)
    rho_new = jnp.where(z_new, jnp.float32(RHO_RESET), rho_dec)
    return z_new.astype(jnp.float32), v_new, i_new, rho_new


# ----------------------------------------------------------------------------
# Single Euler step kernel
# ----------------------------------------------------------------------------
def _lif_refrac_step_kernel(x_ref, v_ref, i_ref, rho_ref,
                            z_out, v_out, i_out, rho_out, *, dt):
    z, v_new, i_new, rho_new = _lif_refrac_math(
        x_ref[...], v_ref[...], i_ref[...], rho_ref[...], dt)
    z_out[...] = z
    v_out[...] = v_new
    i_out[...] = i_new
    rho_out[...] = rho_new


# ----------------------------------------------------------------------------
# Fused T-step kernel: state lives in VMEM scratch across the time axis.
# grid = (row_tiles, T); time axis is "arbitrary" (sequential carry).
# ----------------------------------------------------------------------------
def _lif_refrac_seq_kernel(x_ref, v_in, i_in, rho_in,
                           z_out, v_out, i_out, rho_out,
                           v_sc, i_sc, rho_sc, *, dt):
    t = pl.program_id(1)

    @pl.when(t == 0)
    def _():
        v_sc[...] = v_in[...]
        i_sc[...] = i_in[...]
        rho_sc[...] = rho_in[...]

    z, v_new, i_new, rho_new = _lif_refrac_math(
        x_ref[0], v_sc[...], i_sc[...], rho_sc[...], dt)

    z_out[0] = z
    v_sc[...] = v_new
    i_sc[...] = i_new
    rho_sc[...] = rho_new

    @pl.when(t == pl.num_programs(1) - 1)
    def _():
        v_out[...] = v_sc[...]
        i_out[...] = i_sc[...]
        rho_out[...] = rho_sc[...]


# ----------------------------------------------------------------------------
# Wrapper helpers: lane-dense (rows, 128) slabs, no pad when total % 128 == 0.
# ----------------------------------------------------------------------------
def _row_tiling(rows, tile_rows):
    target = _round_up(max(int(tile_rows), SUBLANE), SUBLANE)
    if rows <= target:
        return rows, 1                 # single block == full array dim (legal)
    return target, pl.cdiv(rows, target)   # partial last block handled by Pallas


def _pack_rows(a, rows, total):
    flat = jnp.asarray(a, jnp.float32).reshape(-1)
    pad = rows * LANE - total
    if pad:                            # only for total % 128 != 0 (tiny pad)
        flat = jnp.pad(flat, (0, pad))
    return flat.reshape(rows, LANE)


def _unpack_rows(slab, out_shape, total):
    flat = slab.reshape(-1)
    if flat.size != total:
        flat = flat[:total]
    return flat.reshape(out_shape)


# ----------------------------------------------------------------------------
# Public API: single step (matches LIFRefracFeedForwardCell.forward)
# ----------------------------------------------------------------------------
def lif_refrac_feed_forward_step(x, state, dt=DT, tile_rows=2048,
                                 donate_state=False):
    """x, state=(v, i, rho): arrays of identical shape.
       Returns (z, (v_new, i_new, rho_new)), all float32, original shape."""
    x = jnp.asarray(x, jnp.float32)
    v, i, rho = state
    orig_shape = x.shape
    total = int(x.size)

    rows = pl.cdiv(total, LANE)
    tile_r, num_tiles = _row_tiling(rows, tile_rows)

    slabs = [_pack_rows(a, rows, total) for a in (x, v, i, rho)]

    block = pl.BlockSpec((tile_r, LANE), lambda r: (r, 0))
    out_sds = jax.ShapeDtypeStruct((rows, LANE), jnp.float32)
    cost = pl.CostEstimate(flops=14 * rows * LANE, transcendentals=0,
                           bytes_accessed=8 * rows * LANE * 4)

    kernel = functools.partial(_lif_refrac_step_kernel, dt=dt)
    outs = pl.pallas_call(
        kernel,
        out_shape=(out_sds,) * 4,
        grid=(num_tiles,),
        in_specs=[block] * 4,
        out_specs=(block,) * 4,
        input_output_aliases={1: 1, 2: 2, 3: 3} if donate_state else {},
        cost_estimate=cost,
        compiler_params=pltpu.CompilerParams(
            dimension_semantics=("parallel",),
            vmem_limit_bytes=VMEM_LIMIT),
    )(*slabs)

    z, v_new, i_new, rho_new = (_unpack_rows(o, orig_shape, total) for o in outs)
    return z, (v_new, i_new, rho_new)


# ----------------------------------------------------------------------------
# Public API: fused sequence of T Euler steps (state resident in VMEM)
# ----------------------------------------------------------------------------
def lif_refrac_feed_forward_sequence(xs, state, dt=DT, tile_rows=2048,
                                     donate_state=False):
    """xs: (T, *shape) input currents; state=(v, i, rho) each (*shape).
       Returns (zs of shape (T, *shape), (v_T, i_T, rho_T))."""
    xs = jnp.asarray(xs, jnp.float32)
    v, i, rho = state
    T = xs.shape[0]
    step_shape = xs.shape[1:]
    total = int(jnp.asarray(v).size)

    rows = pl.cdiv(total, LANE)
    tile_r, num_tiles = _row_tiling(rows, tile_rows)

    x_flat = xs.reshape(T, -1)
    pad = rows * LANE - total
    if pad:
        x_flat = jnp.pad(x_flat, ((0, 0), (0, pad)))
    x_slab = x_flat.reshape(T, rows, LANE)
    state_slabs = [_pack_rows(a, rows, total) for a in (v, i, rho)]

    x_spec = pl.BlockSpec((1, tile_r, LANE), lambda r, t: (t, r, 0))
    z_spec = pl.BlockSpec((1, tile_r, LANE), lambda r, t: (t, r, 0))
    st_spec = pl.BlockSpec((tile_r, LANE), lambda r, t: (r, 0))  # resident over t

    out_shape = (jax.ShapeDtypeStruct((T, rows, LANE), jnp.float32),
                 jax.ShapeDtypeStruct((rows, LANE), jnp.float32),
                 jax.ShapeDtypeStruct((rows, LANE), jnp.float32),
                 jax.ShapeDtypeStruct((rows, LANE), jnp.float32))
    cost = pl.CostEstimate(flops=14 * T * rows * LANE, transcendentals=0,
                           bytes_accessed=(2 * T + 6) * rows * LANE * 4)

    kernel = functools.partial(_lif_refrac_seq_kernel, dt=dt)
    z_s, v_s, i_s, rho_s = pl.pallas_call(
        kernel,
        out_shape=out_shape,
        grid=(num_tiles, T),
        in_specs=[x_spec, st_spec, st_spec, st_spec],
        out_specs=(z_spec, st_spec, st_spec, st_spec),
        scratch_shapes=[pltpu.VMEM((tile_r, LANE), jnp.float32)] * 3,
        input_output_aliases={1: 1, 2: 2, 3: 3} if donate_state else {},
        cost_estimate=cost,
        compiler_params=pltpu.CompilerParams(
            dimension_semantics=("parallel", "arbitrary"),
            vmem_limit_bytes=VMEM_LIMIT),
    )(x_slab, *state_slabs)

    if pad:
        zs = z_s.reshape(T, -1)[:, :total].reshape((T,) + step_shape)
    else:
        zs = z_s.reshape((T,) + step_shape)
    v_new, i_new, rho_new = (_unpack_rows(o, step_shape, total)
                             for o in (v_s, i_s, rho_s))
    return zs, (v_new, i_new, rho_new)


# ----------------------------------------------------------------------------
# Pure-JAX reference (transcription of norse lif_refrac_feed_forward_step)
# ----------------------------------------------------------------------------
def _reference_step(x, v, i, rho, dt=DT):
    x, v, i, rho = (jnp.asarray(a, jnp.float32) for a in (x, v, i, rho))
    dv = dt * TAU_MEM_INV * ((V_LEAK - v) + i)
    v_decayed = v + dv
    di = -dt * TAU_SYN_INV * i
    i_decayed = i + di
    z = ((v_decayed - V_TH) > 0.0).astype(jnp.float32)
    v_after = (1.0 - z) * v_decayed + z * V_RESET
    i_new = i_decayed + x
    refrac = (rho > 0.0).astype(jnp.float32)
    v_new = (1.0 - refrac) * v_after + refrac * v
    z_new = (1.0 - refrac) * z
    rho_new = (1.0 - z_new) * jnp.maximum(rho - refrac, 0.0) + z_new * RHO_RESET
    return z_new, v_new, i_new, rho_new


if __name__ == "__main__":
    key = jax.random.PRNGKey(0)
    kx, kv, ki, kr, ks = jax.random.split(key, 5)
    B, C, H, W = 2, 4, 16, 16
    shape = (B, C, H, W)

    # Input current + non-trivial state so spiking and refractory paths fire.
    x = jax.random.uniform(kx, shape, jnp.float32, 0.0, 2.0)
    v0 = jax.random.uniform(kv, shape, jnp.float32, 0.0, 1.2)
    i0 = jax.random.uniform(ki, shape, jnp.float32, -1.0, 3.0)
    rho0 = jnp.where(jax.random.uniform(kr, shape) > 0.7, 3.0, 0.0).astype(jnp.float32)

    # ---- single Euler step (module forward) ----
    z, (v1, i1, rho1) = lif_refrac_feed_forward_step(x, (v0, i0, rho0))
    jax.block_until_ready((z, v1, i1, rho1))

    z_r, v_r, i_r, rho_r = _reference_step(x, v0, i0, rho0)
    for got, want in ((z, z_r), (v1, v_r), (i1, i_r), (rho1, rho_r)):
        assert got.shape == shape and got.dtype == jnp.float32
        assert float(jnp.max(jnp.abs(got - want))) <= 1e-6

    # sanity: some neurons spiked, refractory neurons never spike
    assert float(jnp.sum(z)) > 0.0
    assert float(jnp.max(z + (rho0 > 0.0).astype(jnp.float32))) <= 1.0

    # ---- fused T-step sequence kernel (state resident in VMEM) ----
    T = 8
    xs = jax.random.uniform(ks, (T,) + shape, jnp.float32, 0.0, 2.0)
    zs, (vT, iT, rhoT) = lif_refrac_feed_forward_sequence(xs, (v0, i0, rho0))
    jax.block_until_ready((zs, vT, iT, rhoT))

    vr, ir, rr = v0, i0, rho0
    zs_ref = []
    for t in range(T):
        zr, vr, ir, rr = _reference_step(xs[t], vr, ir, rr)
        zs_ref.append(zr)
    zs_ref = jnp.stack(zs_ref)
    for got, want in ((zs, zs_ref), (vT, vr), (iT, ir), (rhoT, rr)):
        assert got.dtype == jnp.float32
        assert float(jnp.max(jnp.abs(got - want))) <= 1e-6

    print("KERNEL_OK")
</pallas_src>

<mosaic_0001>
module attributes {stable_mosaic.version = 11 : i64} {
  func.func @_lif_refrac_step_kernel(%arg0: i32, %arg1: memref<16x128xf32, #tpu.memory_space<vmem>>, %arg2: memref<16x128xf32, #tpu.memory_space<vmem>>, %arg3: memref<16x128xf32, #tpu.memory_space<vmem>>, %arg4: memref<16x128xf32, #tpu.memory_space<vmem>>, %arg5: memref<16x128xf32, #tpu.memory_space<vmem>>, %arg6: memref<16x128xf32, #tpu.memory_space<vmem>>, %arg7: memref<16x128xf32, #tpu.memory_space<vmem>>, %arg8: memref<16x128xf32, #tpu.memory_space<vmem>>) attributes {dimension_semantics = [#tpu.dimension_semantics<parallel>], iteration_bounds = array<i64: 1>, scalar_prefetch = 0 : i64, scratch_operands = 0 : i64, tpu.core_type = #tpu.core_type<tc>, window_params = [{transform_indices = @transform_0, window_bounds = array<i64: 16, 128>}, {transform_indices = @transform_1, window_bounds = array<i64: 16, 128>}, {transform_indices = @transform_2, window_bounds = array<i64: 16, 128>}, {transform_indices = @transform_3, window_bounds = array<i64: 16, 128>}, {transform_indices = @transform_4, window_bounds = array<i64: 16, 128>}, {transform_indices = @transform_5, window_bounds = array<i64: 16, 128>}, {transform_indices = @transform_6, window_bounds = array<i64: 16, 128>}, {transform_indices = @transform_7, window_bounds = array<i64: 16, 128>}]} {
    %c0 = arith.constant 0 : index
    %c0_0 = arith.constant 0 : index
    %0 = vector.load %arg1[%c0, %c0_0] : memref<16x128xf32, #tpu.memory_space<vmem>>, vector<16x128xf32>
    %c0_1 = arith.constant 0 : index
    %c0_2 = arith.constant 0 : index
    %1 = vector.load %arg2[%c0_1, %c0_2] : memref<16x128xf32, #tpu.memory_space<vmem>>, vector<16x128xf32>
    %c0_3 = arith.constant 0 : index
    %c0_4 = arith.constant 0 : index
    %2 = vector.load %arg3[%c0_3, %c0_4] : memref<16x128xf32, #tpu.memory_space<vmem>>, vector<16x128xf32>
    %c0_5 = arith.constant 0 : index
    %c0_6 = arith.constant 0 : index
    %3 = vector.load %arg4[%c0_5, %c0_6] : memref<16x128xf32, #tpu.memory_space<vmem>>, vector<16x128xf32>
    %cst = arith.constant 0.000000e+00 : f32
    %4 = vector.broadcast %cst : f32 to vector<16x128xf32>
    %5 = arith.subf %4, %1 : vector<16x128xf32>
    %6 = arith.addf %5, %2 : vector<16x128xf32>
    %cst_7 = arith.constant 1.000000e-01 : f32
    %7 = vector.broadcast %cst_7 : f32 to vector<16x128xf32>
    %8 = arith.mulf %7, %6 : vector<16x128xf32>
    %9 = arith.addf %1, %8 : vector<16x128xf32>
    %cst_8 = arith.constant -2.000000e-01 : f32
    %10 = vector.broadcast %cst_8 : f32 to vector<16x128xf32>
    %11 = arith.mulf %10, %2 : vector<16x128xf32>
    %12 = arith.addf %2, %11 : vector<16x128xf32>
    %cst_9 = arith.constant 1.000000e+00 : f32
    %13 = vector.broadcast %cst_9 : f32 to vector<16x128xf32>
    %14 = arith.subf %9, %13 : vector<16x128xf32>
    %cst_10 = arith.constant 0.000000e+00 : f32
    %15 = vector.broadcast %cst_10 : f32 to vector<16x128xf32>
    %16 = arith.cmpf ogt, %14, %15 : vector<16x128xf32>
    %cst_11 = arith.constant 0.000000e+00 : f32
    %17 = vector.broadcast %cst_11 : f32 to vector<16x128xf32>
    %18 = arith.select %16, %17, %9 : vector<16x128xi1>, vector<16x128xf32>
    %19 = arith.addf %12, %0 : vector<16x128xf32>
    %cst_12 = arith.constant 0.000000e+00 : f32
    %20 = vector.broadcast %cst_12 : f32 to vector<16x128xf32>
    %21 = arith.cmpf ogt, %3, %20 : vector<16x128xf32>
    %22 = arith.select %21, %1, %18 : vector<16x128xi1>, vector<16x128xf32>
    %cst_13 = arith.constant dense<true> : vector<16x128xi1>
    %23 = arith.xori %21, %cst_13 : vector<16x128xi1>
    %24 = arith.andi %16, %23 : vector<16x128xi1>
    %cst_14 = arith.constant 1.000000e+00 : f32
    %25 = vector.broadcast %cst_14 : f32 to vector<16x128xf32>
    %26 = arith.subf %3, %25 : vector<16x128xf32>
    %27 = arith.select %21, %26, %3 : vector<16x128xi1>, vector<16x128xf32>
    %cst_15 = arith.constant 0.000000e+00 : f32
    %28 = vector.broadcast %cst_15 : f32 to vector<16x128xf32>
    %29 = arith.maximumf %27, %28 : vector<16x128xf32>
    %cst_16 = arith.constant 5.000000e+00 : f32
    %30 = vector.broadcast %cst_16 : f32 to vector<16x128xf32>
    %31 = arith.select %24, %30, %29 : vector<16x128xi1>, vector<16x128xf32>
    %32 = arith.extui %24 : vector<16x128xi1> to vector<16x128xi32>
    %33 = arith.sitofp %32 : vector<16x128xi32> to vector<16x128xf32>
    %c0_17 = arith.constant 0 : index
    %c0_18 = arith.constant 0 : index
    %34 = vector.load %arg5[%c0_17, %c0_18] : memref<16x128xf32, #tpu.memory_space<vmem>>, vector<16x128xf32>
    tpu.vector_store %arg5[%c0_17, %c0_18], %33 {strides = array<i32>} : memref<16x128xf32, #tpu.memory_space<vmem>>, vector<16x128xf32>,
    %c0_19 = arith.constant 0 : index
    %c0_20 = arith.constant 0 : index
    %35 = vector.load %arg6[%c0_19, %c0_20] : memref<16x128xf32, #tpu.memory_space<vmem>>, vector<16x128xf32>
    tpu.vector_store %arg6[%c0_19, %c0_20], %22 {strides = array<i32>} : memref<16x128xf32, #tpu.memory_space<vmem>>, vector<16x128xf32>,
    %c0_21 = arith.constant 0 : index
    %c0_22 = arith.constant 0 : index
    %36 = vector.load %arg7[%c0_21, %c0_22] : memref<16x128xf32, #tpu.memory_space<vmem>>, vector<16x128xf32>
    tpu.vector_store %arg7[%c0_21, %c0_22], %19 {strides = array<i32>} : memref<16x128xf32, #tpu.memory_space<vmem>>, vector<16x128xf32>,
    %c0_23 = arith.constant 0 : index
    %c0_24 = arith.constant 0 : index
    %37 = vector.load %arg8[%c0_23, %c0_24] : memref<16x128xf32, #tpu.memory_space<vmem>>, vector<16x128xf32>
    tpu.vector_store %arg8[%c0_23, %c0_24], %31 {strides = array<i32>} : memref<16x128xf32, #tpu.memory_space<vmem>>, vector<16x128xf32>,
    return
  }
  func.func @transform_0(%arg0: i32) -> (i32, i32) {
    %c0_i32 = arith.constant 0 : i32
    %c0_i32_0 = arith.constant 0 : i32
    return %arg0, %c0_i32 : i32, i32
  }
  func.func @transform_1(%arg0: i32) -> (i32, i32) {
    %c0_i32 = arith.constant 0 : i32
    %c0_i32_0 = arith.constant 0 : i32
    return %arg0, %c0_i32 : i32, i32
  }
  func.func @transform_2(%arg0: i32) -> (i32, i32) {
    %c0_i32 = arith.constant 0 : i32
    %c0_i32_0 = arith.constant 0 : i32
    return %arg0, %c0_i32 : i32, i32
  }
  func.func @transform_3(%arg0: i32) -> (i32, i32) {
    %c0_i32 = arith.constant 0 : i32
    %c0_i32_0 = arith.constant 0 : i32
    return %arg0, %c0_i32 : i32, i32
  }
  func.func @transform_4(%arg0: i32) -> (i32, i32) {
    %c0_i32 = arith.constant 0 : i32
    %c0_i32_0 = arith.constant 0 : i32
    return %arg0, %c0_i32 : i32, i32
  }
  func.func @transform_5(%arg0: i32) -> (i32, i32) {
    %c0_i32 = arith.constant 0 : i32
    %c0_i32_0 = arith.constant 0 : i32
    return %arg0, %c0_i32 : i32, i32
  }
  func.func @transform_6(%arg0: i32) -> (i32, i32) {
    %c0_i32 = arith.constant 0 : i32
    %c0_i32_0 = arith.constant 0 : i32
    return %arg0, %c0_i32 : i32, i32
  }
  func.func @transform_7(%arg0: i32) -> (i32, i32) {
    %c0_i32 = arith.constant 0 : i32
    %c0_i32_0 = arith.constant 0 : i32
    return %arg0, %c0_i32 : i32, i32
  }
}

</mosaic_0001>

<bundles_post_ra>
// kernel: tpu_custom_call.1
= control target key start
LH: loop header
LB: loop body
LE: loop exit
PB: predicated region body
PF: predicated region fallthrough
CT: control target
= control target key end

     0   :  { %13 = vsyncpa [#allocation3], 0  ;;  %s626_s0 = inlined_call_operand.hbm [shape: f32[16,128], index: 0, kind: input, shape index: {}]   ;;  %s627_s1 = inlined_call_operand.hbm [shape: f32[16,128], index: 1, kind: input, shape index: {}]   ;;  %s628_s2 = inlined_call_operand.hbm [shape: f32[16,128], index: 2, kind: input, shape index: {}]   ;;  %s629_s3 = inlined_call_operand.hbm [shape: f32[16,128], index: 3, kind: input, shape index: {}]   ;;  %s630_s4 = inlined_call_operand.hbm [shape: f32[16,128], index: 4, kind: output, shape index: {0}]   ;;  %s631_s5 = inlined_call_operand.hbm [shape: f32[16,128], index: 5, kind: output, shape index: {1}]   ;;  %s632_s6 = inlined_call_operand.hbm [shape: f32[16,128], index: 6, kind: output, shape index: {2}]   ;;  %s633_s7 = inlined_call_operand.hbm [shape: f32[16,128], index: 7, kind: output, shape index: {3}]  }
   0x1   :  { %14 = vsyncpa [#allocation6], 0 }
   0x2   :  { %15 = vsyncpa [#allocation9], 0 }
   0x3   :  { %16 = vsyncpa [#allocation4], 0 }
   0x4   :  { %17 = vsyncpa [#allocation12], 0 }
   0x5   :  { %18 = vsyncpa [#allocation15], 0  ;;  %s407_s24 = smov [#allocation5]   ;;  %s408_s26 = smov [#allocation2]  }
   0x6   :  { %s36_s25 = sshll.u32 %s407_s24, 4  ;;  %s24_s27 = sshll.u32 %s408_s26, 4  ;;  %s37_s25 = int_to_ptr.vmem [resolvable:$true] %s36_s25  ;;  %s459_s27 = int_to_ptr.vmem [resolvable:$true] %s24_s27 }
   0x7   :  { %s219_s30 = scalar_lea.hbm %s627_s1, 256 }
   0x8   :  { %p220_p0 = scmp.ne.s32.totalorder %s627_s1, %s219_s30  ;;  %p223_p1 = scmp.lt.u32.totalorder %s219_s30, %s627_s1 }
   0xa   :  { %p225_p2 = pnand %p223_p1, %p220_p0 }
   0xc   :  { %228 = shalt.err (!%p225_p2)
}
   0xd   :  { %s229_s12 = scalar_lea.vmem %s37_s25, 256  ;;  %p234_p4 = scmp.lt.s32.totalorder %s37_s25, %s37_s25 }
   0xe   :  { %p230_p3 = scmp.ne.s32.totalorder %s37_s25, %s229_s12  ;;  %p235_p5 = scmp.lt.s32.totalorder %s229_s12, %s229_s12 }
  0x10   :  { %p236_p6 = por %p235_p5, %p234_p4 }
  0x12   :  { %p237_p7 = pnand %p236_p6, %p230_p3 }
  0x14   :  { %240 = shalt.err (!%p237_p7)
}
  0x15   :  { %s409_s13 = smov 128   ;;  %s410_s14 = smov 8  }
  0x16   :  { %42 = dma.hbm_to_vmem [thread:$0]  %s627_s1, 256, %s37_s25, [#allocation6], %s409_s13, %s409_s13, %s410_s14  }
  0x17   :  { %s241_s19 = scalar_lea.hbm %s626_s0, 256 }
  0x18   :  { %p242_p8 = scmp.ne.s32.totalorder %s626_s0, %s241_s19  ;;  %p245_p9 = scmp.lt.u32.totalorder %s241_s19, %s626_s0 }
  0x1a   :  { %p247_p10 = pnand %p245_p9, %p242_p8 }
  0x1c   :  { %250 = shalt.err (!%p247_p10)
}
  0x1d   :  { %s251_s24 = scalar_lea.vmem %s459_s27, 256  ;;  %p256_p12 = scmp.lt.s32.totalorder %s459_s27, %s459_s27 }
  0x1e   :  { %p252_p11 = scmp.ne.s32.totalorder %s459_s27, %s251_s24  ;;  %p257_p13 = scmp.lt.s32.totalorder %s251_s24, %s251_s24 }
  0x20   :  { %p258_p0 = por %p257_p13, %p256_p12 }
  0x22   :  { %p259_p1 = pnand %p258_p0, %p252_p11 }
  0x24   :  { %262 = shalt.err (!%p259_p1)
}
  0x25   :  { %30 = dma.hbm_to_vmem [thread:$0]  %s626_s0, 256, %s459_s27, [#allocation3], %s409_s13, %s409_s13, %s410_s14  }
  0x26   :  { %s411_s26 = smov [#allocation7]   ;;  %s412_s29 = smov [#allocation8]  }
  0x27   :  { %s48_s28 = sshll.u32 %s411_s26, 4  ;;  %s60_s30 = sshll.u32 %s412_s29, 4  ;;  %s49_s28 = int_to_ptr.vmem [resolvable:$true] %s48_s28  ;;  %s496_s30 = int_to_ptr.vmem [resolvable:$true] %s60_s30 }
  0x28   :  { %s263_s10 = scalar_lea.hbm %s628_s2, 256 }
  0x29   :  { %p264_p2 = scmp.ne.s32.totalorder %s628_s2, %s263_s10  ;;  %p267_p3 = scmp.lt.u32.totalorder %s263_s10, %s628_s2 }
  0x2b   :  { %p269_p4 = pnand %p267_p3, %p264_p2 }
  0x2d   :  { %272 = shalt.err (!%p269_p4)
}
  0x2e   :  { %s273_s0 = scalar_lea.vmem %s49_s28, 256  ;;  %p278_p6 = scmp.lt.s32.totalorder %s49_s28, %s49_s28 }
  0x2f   :  { %p274_p5 = scmp.ne.s32.totalorder %s49_s28, %s273_s0  ;;  %p279_p7 = scmp.lt.s32.totalorder %s273_s0, %s273_s0 }
  0x31   :  { %p280_p8 = por %p279_p7, %p278_p6 }
  0x33   :  { %p281_p9 = pnand %p280_p8, %p274_p5 }
  0x35   :  { %284 = shalt.err (!%p281_p9)
}
  0x36   :  { %54 = dma.hbm_to_vmem [thread:$0]  %s628_s2, 256, %s49_s28, [#allocation6], %s409_s13, %s409_s13, %s410_s14  }
  0x37   :  { %s285_s20 = scalar_lea.hbm %s629_s3, 256 }
  0x38   :  { %p286_p10 = scmp.ne.s32.totalorder %s629_s3, %s285_s20  ;;  %p289_p11 = scmp.lt.u32.totalorder %s285_s20, %s629_s3 }
  0x3a   :  { %p291_p12 = pnand %p289_p11, %p286_p10 }
  0x3c   :  { %294 = shalt.err (!%p291_p12)
}
  0x3d   :  { %s295_s1 = scalar_lea.vmem %s496_s30, 256  ;;  %p300_p0 = scmp.lt.s32.totalorder %s496_s30, %s496_s30 }
  0x3e   :  { %p296_p13 = scmp.ne.s32.totalorder %s496_s30, %s295_s1  ;;  %p301_p1 = scmp.lt.s32.totalorder %s295_s1, %s295_s1 }
  0x40   :  { %p302_p2 = por %p301_p1, %p300_p0 }
  0x42   :  { %p303_p3 = pnand %p302_p2, %p296_p13 }
  0x44   :  { %306 = shalt.err (!%p303_p3)
}
  0x45   :  { %66 = dma.hbm_to_vmem [thread:$0]  %s629_s3, 256, %s496_s30, [#allocation9], %s409_s13, %s409_s13, %s410_s14  }
  0x46   :  { %395 = dma.done.wait [#allocation3], 256  }
  0x47   :  { %396 = vsyncadd [#allocation3], 4294967040 }
  0x48   :  { %397 = dma.done.wait [#allocation6], 512  }
  0x49   :  { %398 = vsyncadd [#allocation6], 4294966784 }
  0x4a   :  { %399 = dma.done.wait [#allocation9], 256  }
  0x4b   :  { %400 = vsyncadd [#allocation9], 4294967040  ;;  %v81_v0 = vld [vmem:[#allocation5] sm:$0xff]  ;;  %v83_v1 = vld [vmem:[#allocation7] sm:$0xff]  ;;  %vm413_vm2 = vmmov 1   ;;  %s414_s3 = smov [#allocation11]  }
  0x4c   :  { %v85_v2 = vld [vmem:[#allocation8] sm:$0xff]  ;;  %v87_v3 = vsub.f32 0.0, %v81_v0  ;;  %v82_v4 = vld [vmem:[#allocation5 + $0x8] sm:$0xff]  ;;  %v84_v5 = vld [vmem:[#allocation7 + $0x8] sm:$0xff]  ;;  %v95_v8 = vmul.f32 -0.2, %v83_v1 }
  0x4d   :  { %v86_v6 = vld [vmem:[#allocation8 + $0x8] sm:$0xff]  ;;  %v88_v7 = vsub.f32 0.0, %v82_v4  ;;  %v203_v9 = vadd.f32 -1.0, %v85_v2  ;;  %vm107_vm0 = vcmp.gt.f32.partialorder %v85_v2, 0.0  ;;  %v79_v11 = vld [vmem:[#allocation2] sm:$0xff]  ;;  %v80_v16 = vld [vmem:[#allocation2 + $0x8] sm:$0xff] }
  0x4e   :  { %v89_v10 = vadd.f32 %v87_v3, %v83_v1  ;;  %v96_v12 = vmul.f32 -0.2, %v84_v5  ;;  %v204_v13 = vadd.f32 -1.0, %v86_v6  ;;  %vm108_vm1 = vcmp.gt.f32.partialorder %v86_v6, 0.0  ;;  %vm111_vm3 = vmxor %vm107_vm0, %vm413_vm2  ;;  %s152_s26 = sshll.u32 %s414_s3, 4  ;;  %s415_s28 = smov [#allocation10]   ;;  %s153_s26 = int_to_ptr.vmem [resolvable:$true] %s152_s26 }
  0x4f   :  { %v90_v14 = vadd.f32 %v88_v7, %v84_v5  ;;  %v97_v15 = vadd.f32 %v95_v8, %v83_v1  ;;  %v117_v21 = vsel %vm107_vm0, %v203_v9, %v85_v2  ;;  %vm537_vm4 = vmxor %vm108_vm1, %vm413_vm2  ;;  %s140_s29 = sshll.u32 %s415_s28, 4  ;;  %s416_s30 = smov [#allocation13]   ;;  %v418_v34 = vmov 0.0   ;;  %s545_s29 = int_to_ptr.vmem [resolvable:$true] %s140_s29 }
  0x50   :  { %v91_v17 = vmul.f32 0.1, %v89_v10  ;;  %v98_v18 = vadd.f32 %v96_v12, %v84_v5  ;;  %v118_v24 = vsel %vm108_vm1, %v204_v13, %v86_v6  ;;  %v119_v27 = vmax.f32 %v117_v21, 0.0  ;;  %s164_s8 = sshll.u32 %s416_s30, 4  ;;  %s417_s9 = smov [#allocation14]   ;;  %s547_s8 = int_to_ptr.vmem [resolvable:$true] %s164_s8 }
  0x51   :  { %v92_v19 = vmul.f32 0.1, %v90_v14  ;;  %v105_v20 = vadd.f32 %v97_v15, %v79_v11  ;;  %v120_v30 = vmax.f32 %v118_v24, 0.0  ;;  %s176_s10 = sshll.u32 %s417_s9, 4  ;;  %s307_s11 = scalar_lea.vmem %s153_s26, 256  ;;  %s549_s10 = int_to_ptr.vmem [resolvable:$true] %s176_s10 }
  0x52   :  { %v93_v22 = vadd.f32 %v91_v17, %v81_v0  ;;  %v106_v23 = vadd.f32 %v98_v18, %v80_v16  ;;  %p308_p4 = scmp.ne.s32.totalorder %s153_s26, %s307_s11  ;;  %p312_p5 = scmp.lt.s32.totalorder %s153_s26, %s153_s26 }
  0x53   :  { %v94_v25 = vadd.f32 %v92_v19, %v82_v4  ;;  %131 = vst [vmem:[#allocation13] sm:$0xff] %v105_v20  ;;  %p313_p6 = scmp.lt.s32.totalorder %s307_s11, %s307_s11 }
  0x54   :  { %v201_v26 = vadd.f32 -1.0, %v93_v22  ;;  %132 = vst [vmem:[#allocation13 + $0x8] sm:$0xff] %v106_v23 }
  0x55   :  { %v202_v28 = vadd.f32 -1.0, %v94_v25  ;;  %p314_p7 = por %p313_p6, %p312_p5 }
  0x56   :  { %vm101_vm5 = vcmp.gt.f32.partialorder %v201_v26, 0.0 }
  0x57   :  { %v103_v31 = vsel %vm101_vm5, 0.0, %v93_v22  ;;  %vm102_vm6 = vcmp.gt.f32.partialorder %v202_v28, 0.0  ;;  %vm113_vm7 = vmand %vm101_vm5, %vm111_vm3  ;;  %p315_p8 = pnand %p314_p7, %p308_p4 }
  0x58   :  { %v109_v32 = vsel %vm107_vm0, %v81_v0, %v103_v31  ;;  %v104_v33 = vsel %vm102_vm6, 0.0, %v94_v25  ;;  %v205_v35 = vsel %vm113_vm7, 1.0, %v418_v34  ;;  %vm114_vm8 = vmand %vm102_vm6, %vm537_vm4  ;;  %v121_v36 = vsel %vm113_vm7, 5.0, %v119_v27 }
  0x59   :  { %129 = vst [vmem:[#allocation11] sm:$0xff] %v109_v32  ;;  %v110_v37 = vsel %vm108_vm1, %v82_v4, %v104_v33  ;;  %127 = vst [vmem:[#allocation10] sm:$0xff] %v205_v35  ;;  %v206_v38 = vsel %vm114_vm8, 1.0, %v418_v34  ;;  %v122_v39 = vsel %vm114_vm8, 5.0, %v120_v30 }
  0x5a   :  { %133 = vst [vmem:[#allocation14] sm:$0xff] %v121_v36  ;;  %130 = vst [vmem:[#allocation11 + $0x8] sm:$0xff] %v110_v37 }
  0x5b   :  { %128 = vst [vmem:[#allocation10 + $0x8] sm:$0xff] %v206_v38  ;;  %134 = vst [vmem:[#allocation14 + $0x8] sm:$0xff] %v122_v39 }
  0x5c   :  { %318 = shalt.err (!%p315_p8)
}
  0x5d   :  { %s319_s16 = scalar_lea.hbm %s631_s5, 256 }
  0x5e   :  { %p320_p9 = scmp.ne.s32.totalorder %s631_s5, %s319_s16  ;;  %p323_p10 = scmp.lt.u32.totalorder %s319_s16, %s631_s5 }
  0x60   :  { %p325_p11 = pnand %p323_p10, %p320_p9 }
  0x62   :  { %328 = shalt.err (!%p325_p11)
}
  0x63   :  { %158 = dma.vmem_to_hbm [thread:$0]  %s153_s26, 256, %s631_s5, [#allocation12], %s409_s13, %s409_s13, %s410_s14  }
  0x64   :  { %s329_s21 = scalar_lea.vmem %s545_s29, 256  ;;  %p334_p13 = scmp.lt.s32.totalorder %s545_s29, %s545_s29 }
  0x65   :  { %p330_p12 = scmp.ne.s32.totalorder %s545_s29, %s329_s21  ;;  %p335_p0 = scmp.lt.s32.totalorder %s329_s21, %s329_s21 }
  0x67   :  { %p336_p1 = por %p335_p0, %p334_p13 }
  0x69   :  { %p337_p2 = pnand %p336_p1, %p330_p12 }
  0x6b   :  { %340 = shalt.err (!%p337_p2)
}
  0x6c   :  { %s341_s24 = scalar_lea.hbm %s630_s4, 256 }
  0x6d   :  { %p342_p3 = scmp.ne.s32.totalorder %s630_s4, %s341_s24  ;;  %p345_p4 = scmp.lt.u32.totalorder %s341_s24, %s630_s4 }
  0x6f   :  { %p347_p5 = pnand %p345_p4, %p342_p3 }
  0x71   :  { %350 = shalt.err (!%p347_p5)
}
  0x72   :  { %146 = dma.vmem_to_hbm [thread:$0]  %s545_s29, 256, %s630_s4, [#allocation4], %s409_s13, %s409_s13, %s410_s14  }
  0x73   :  { %s351_s28 = scalar_lea.vmem %s547_s8, 256  ;;  %p356_p7 = scmp.lt.s32.totalorder %s547_s8, %s547_s8 }
  0x74   :  { %p352_p6 = scmp.ne.s32.totalorder %s547_s8, %s351_s28  ;;  %p357_p8 = scmp.lt.s32.totalorder %s351_s28, %s351_s28 }
  0x76   :  { %p358_p9 = por %p357_p8, %p356_p7 }
  0x78   :  { %p359_p10 = pnand %p358_p9, %p352_p6 }
  0x7a   :  { %362 = shalt.err (!%p359_p10)
}
  0x7b   :  { %s363_s11 = scalar_lea.hbm %s632_s6, 256 }
  0x7c   :  { %p364_p11 = scmp.ne.s32.totalorder %s632_s6, %s363_s11  ;;  %p367_p12 = scmp.lt.u32.totalorder %s363_s11, %s632_s6 }
  0x7e   :  { %p369_p13 = pnand %p367_p12, %p364_p11 }
  0x80   :  { %372 = shalt.err (!%p369_p13)
}
  0x81   :  { %170 = dma.vmem_to_hbm [thread:$0]  %s547_s8, 256, %s632_s6, [#allocation12], %s409_s13, %s409_s13, %s410_s14  }
  0x82   :  { %s373_s27 = scalar_lea.vmem %s549_s10, 256  ;;  %p378_p1 = scmp.lt.s32.totalorder %s549_s10, %s549_s10 }
  0x83   :  { %p374_p0 = scmp.ne.s32.totalorder %s549_s10, %s373_s27  ;;  %p379_p2 = scmp.lt.s32.totalorder %s373_s27, %s373_s27 }
  0x85   :  { %p380_p3 = por %p379_p2, %p378_p1 }
  0x87   :  { %p381_p4 = pnand %p380_p3, %p374_p0 }
  0x89   :  { %384 = shalt.err (!%p381_p4)
}
  0x8a   :  { %s385_s19 = scalar_lea.hbm %s633_s7, 256 }
  0x8b   :  { %p386_p5 = scmp.ne.s32.totalorder %s633_s7, %s385_s19  ;;  %p389_p6 = scmp.lt.u32.totalorder %s385_s19, %s633_s7 }
  0x8d   :  { %p391_p7 = pnand %p389_p6, %p386_p5 }
  0x8f   :  { %394 = shalt.err (!%p391_p7)
}
  0x90   :  { %182 = dma.vmem_to_hbm [thread:$0]  %s549_s10, 256, %s633_s7, [#allocation15], %s409_s13, %s409_s13, %s410_s14  }
  0x91   :  { %401 = dma.done.wait [#allocation4], 256  }
  0x92   :  { %402 = vsyncadd [#allocation4], 4294967040 }
  0x93   :  { %403 = dma.done.wait [#allocation12], 512  }
  0x94   :  { %404 = vsyncadd [#allocation12], 4294966784 }
  0x95   :  { %405 = dma.done.wait [#allocation15], 256  }
  0x96   :  { %406 = vsyncadd [#allocation15], 4294967040 }
  0x97   :  { %195 = vsyncpa [#allocation3], 1 }
  0x98   :  { %196 = vsyncpa [#allocation6], 1 }
  0x99   :  { %197 = vsyncpa [#allocation9], 1 }
  0x9a   :  { %198 = vsyncpa [#allocation4], 1 }
  0x9b   :  { %199 = vsyncpa [#allocation12], 1 }
  0x9c   :  { %200 = vsyncpa [#allocation15], 1 }

</bundles_post_ra>
